<compile_context>
chip_gen: v7x
topology: tpu7x:2x2x1
jax: 0.10.0
libtpu: 0.0.40
codegen_flags: <defaults>
</compile_context>

<pallas_src>
import functools

import jax
import jax.numpy as jnp
from jax import lax
from jax.experimental import pallas as pl
from jax.experimental.pallas import tpu as pltpu

_LANES = 128
_SUBLANES = 8
_MAX_BLOCK_ROWS = 2048    # 2048 x 128 x 4B = 1 MiB per f32 input block
_CHUNK_ROWS = 256         # in-kernel sub-chunk: 256 x 128 x 4B = 128 KiB (32 vregs)
_PAD_X = -30000.0         # pad logit (finite in fp16/bf16/f32): bce == 0 exactly


def _min_sublanes(dtype):
    bits = jnp.dtype(dtype).itemsize * 8
    if bits >= 32:
        return 8
    if bits == 16:
        return 16
    return 32


def _vmem_limit(buffer_bytes):
    # Double-buffered streamed blocks + in-kernel f32 chunk intermediates +
    # compiler scratch headroom; capped at the v7x scoped default (32 MiB).
    return int(min(32 << 20, max(16 << 20, buffer_bytes + (8 << 20))))


def _detect_num_tensorcores():
    """Best-effort TensorCores-per-chip query (v7x has 2); defaults to 1."""
    try:
        info = pltpu.get_tpu_info()
    except Exception:
        return 1
    for name in ("num_cores", "cores_per_chip", "num_tensorcores", "core_count"):
        v = getattr(info, name, None)
        if isinstance(v, int) and 1 <= v <= 2:
            return v
    return 1


def _pow(q, gamma):
    """q**gamma; integer gamma lowers to repeated multiplies (no EUP exp/log)."""
    g = float(gamma)
    if g == int(g) and 0 <= int(g) <= 32:
        gi = int(g)
        if gi == 0:
            return jnp.ones_like(q)
        w = q
        for _ in range(gi - 1):
            w = w * q
        return w
    return jnp.power(q, jnp.float32(g))


def _focal_elementwise(x, t, gamma, binary_targets):
    """Unscaled focal term (1 - p_t)**gamma * bce, computed in f32."""
    z = jnp.exp(-jnp.abs(x))                              # EUP exp #1
    # Numerically-stable BCE with logits (== F.binary_cross_entropy_with_logits).
    bce = jnp.maximum(x, 0.0) - x * t + jnp.log1p(z)      # EUP log  #2
    if binary_targets:
        # Exact for t in {0,1}:  p_t = exp(-bce) = [t == (x>0) ? 1 : z] / (1+z)
        # -> drops the third EUP transcendental (matters on compute-bound v7x).
        num = jnp.where(t == (x > 0.0).astype(t.dtype), 1.0, z)
        p_t = num * pl.reciprocal(1.0 + z, approx=True)
    else:
        p_t = jnp.exp(-bce)                               # EUP exp #3
    return _pow(1.0 - p_t, gamma) * bce


def _foreach_row_chunk(nrows, chunk_rows, fn):
    """Invoke fn(row_start, num_rows) over [0, nrows) in chunk_rows pieces.

    nrows / chunk_rows are static multiples of 8; chunking caps live f32
    intermediates (~32 vregs per chunk) instead of spilling full-block temps.
    """
    nfull, rem = divmod(nrows, chunk_rows)
    if nfull == 1 and rem == 0:
        fn(0, chunk_rows)
    elif nfull > 0:
        def body(c, carry):
            fn(pl.multiple_of(c * chunk_rows, 8), chunk_rows)
            return carry
        lax.fori_loop(0, nfull, body, 0, unroll=(nfull <= 8))
    if rem > 0:
        fn(nfull * chunk_rows, rem)


def _focal_sum_kernel(x_ref, t_ref, o_ref, *, nb_full, tail_rows, block_rows,
                      blocks_per_split, gamma, binary_targets, chunk_rows):
    s = pl.program_id(0)          # core split (disjoint output blocks)
    i = pl.program_id(1)          # serial reduction over row blocks

    @pl.when(i == 0)
    def _init():
        o_ref[...] = jnp.zeros_like(o_ref)

    def accum(r0, nr):
        x = x_ref[pl.ds(r0, nr), :].astype(jnp.float32)
        t = t_ref[pl.ds(r0, nr), :].astype(jnp.float32)
        f = _focal_elementwise(x, t, gamma, binary_targets)
        # VPU-only partial reduce into the resident (8,128) accumulator.
        o_ref[...] += jnp.sum(f.reshape(-1, _SUBLANES, _LANES), axis=0)

    blk = s * blocks_per_split + i          # logical (unclamped) block id

    @pl.when(blk < nb_full)                 # steady state: full, unmasked block
    def _full():
        _foreach_row_chunk(block_rows, chunk_rows, accum)

    if tail_rows > 0:                       # single partial block: static slice
        @pl.when(blk == nb_full)
        def _tail():
            _foreach_row_chunk(tail_rows, chunk_rows, accum)
    # blk > last logical block (clamped duplicate of an uneven split): no-op.


def _focal_none_kernel(x_ref, t_ref, o_ref, *, alpha, gamma, binary_targets,
                       chunk_rows):
    def write(r0, nr):
        x = x_ref[pl.ds(r0, nr), :].astype(jnp.float32)
        t = t_ref[pl.ds(r0, nr), :].astype(jnp.float32)
        f = jnp.float32(alpha) * _focal_elementwise(x, t, gamma, binary_targets)
        o_ref[pl.ds(r0, nr), :] = f.astype(o_ref.dtype)

    _foreach_row_chunk(x_ref.shape[0], chunk_rows, write)


def focal_loss(inputs, targets, alpha=1.0, gamma=2.0, reduction="mean",
               binary_targets=False, max_block_rows=None):
    """Binary focal loss with logits. inputs/targets: identical shapes."""
    assert inputs.shape == targets.shape
    n = int(inputs.size)
    max_block_rows = _MAX_BLOCK_ROWS if max_block_rows is None else int(max_block_rows)

    x_flat = inputs.reshape(-1)
    t_flat = targets.reshape(-1)

    sub = max(_min_sublanes(inputs.dtype), _min_sublanes(targets.dtype))
    tile = sub * _LANES
    if n % tile != 0:
        pad = tile - n % tile
        # Pad value chosen so bce == 0 and p_t == 1 exactly -> focal term is 0,
        # letting the reduction kernel skip per-element masking entirely.
        x_flat = jnp.pad(x_flat, (0, pad), constant_values=_PAD_X)
        t_flat = jnp.pad(t_flat, (0, pad), constant_values=0)

    m_rows = x_flat.size // _LANES          # multiple of `sub` (>= 8)
    x2d = x_flat.reshape(m_rows, _LANES)
    t2d = t_flat.reshape(m_rows, _LANES)

    # Largest block that fits (amortizes grid-step overhead), kept a multiple
    # of the dtype's minimum sublane tile.
    block_rows = min(max(max_block_rows - max_block_rows % sub, sub), m_rows)
    chunk_rows = min(_CHUNK_ROWS, block_rows)
    in_bytes_per_elem = x2d.dtype.itemsize + t2d.dtype.itemsize
    n_transcendentals = (2 if binary_targets else 3) * n

    if reduction == "none":
        out_dtype = (inputs.dtype if jnp.issubdtype(inputs.dtype, jnp.floating)
                     else jnp.float32)
        out_itemsize = jnp.dtype(out_dtype).itemsize
        nb = pl.cdiv(m_rows, block_rows)
        kernel = functools.partial(_focal_none_kernel, alpha=float(alpha),
                                   gamma=float(gamma),
                                   binary_targets=binary_targets,
                                   chunk_rows=chunk_rows)
        blk_spec = pl.BlockSpec((block_rows, _LANES), lambda i: (i, 0))
        vmem_needed = 2 * block_rows * _LANES * (in_bytes_per_elem + out_itemsize)
        out2d = pl.pallas_call(
            kernel,
            out_shape=jax.ShapeDtypeStruct((m_rows, _LANES), out_dtype),
            grid_spec=pltpu.PrefetchScalarGridSpec(
                num_scalar_prefetch=0, grid=(nb,),
                in_specs=[blk_spec, blk_spec], out_specs=blk_spec),
            compiler_params=pltpu.CompilerParams(
                dimension_semantics=(pltpu.PARALLEL,),
                vmem_limit_bytes=_vmem_limit(vmem_needed)),
            cost_estimate=pl.CostEstimate(
                flops=15 * n, transcendentals=n_transcendentals,
                bytes_accessed=n * (in_bytes_per_elem + out_itemsize)),
        )(x2d, t2d)
        return out2d.reshape(-1)[:n].reshape(inputs.shape)

    if reduction == "mean":
        scale = float(alpha) / float(n)     # alpha folded into the final scale
    elif reduction == "sum":
        scale = float(alpha)
    else:
        raise ValueError(f"unknown reduction: {reduction!r}")

    nb_full, tail_rows = divmod(m_rows, block_rows)
    nb_total = nb_full + (1 if tail_rows else 0)
    num_splits = min(_detect_num_tensorcores(), nb_total)

    def run(splits, semantics):
        bps = pl.cdiv(nb_total, splits)
        kernel = functools.partial(
            _focal_sum_kernel, nb_full=nb_full, tail_rows=tail_rows,
            block_rows=block_rows, blocks_per_split=bps, gamma=float(gamma),
            binary_targets=binary_targets, chunk_rows=chunk_rows)

        def in_map(s, i):
            # Clamp the DMA into range; out-of-range logical blocks (only the
            # duplicates of an uneven core split) are skipped by a scalar
            # pl.when guard in the kernel, so nothing is double counted.
            return (jnp.minimum(s * bps + i, nb_total - 1), 0)

        in_spec = pl.BlockSpec((block_rows, _LANES), in_map)
        vmem_needed = 2 * block_rows * _LANES * in_bytes_per_elem
        return pl.pallas_call(
            kernel,
            out_shape=jax.ShapeDtypeStruct((splits * _SUBLANES, _LANES),
                                           jnp.float32),
            grid_spec=pltpu.PrefetchScalarGridSpec(
                num_scalar_prefetch=0, grid=(splits, bps),
                in_specs=[in_spec, in_spec],
                out_specs=pl.BlockSpec((_SUBLANES, _LANES),
                                       lambda s, i: (s, 0))),
            compiler_params=pltpu.CompilerParams(
                dimension_semantics=semantics,
                vmem_limit_bytes=_vmem_limit(vmem_needed)),
            cost_estimate=pl.CostEstimate(
                flops=15 * n, transcendentals=n_transcendentals,
                bytes_accessed=n * in_bytes_per_elem),
        )(x2d, t2d)

    if num_splits > 1:
        try:
            # v7x: shard the leading axis across the two TensorCores.
            partials = jax.block_until_ready(
                run(num_splits, (pltpu.CORE_PARALLEL, pltpu.ARBITRARY)))
        except Exception:
            partials = run(1, (pltpu.PARALLEL, pltpu.ARBITRARY))
    else:
        partials = run(1, (pltpu.PARALLEL, pltpu.ARBITRARY))

    # Single tiny cross-lane reduce of the per-split (8,128) partial sums.
    return jnp.sum(partials, dtype=jnp.float32) * jnp.float32(scale)


def _focal_ref_elem(inputs, targets, alpha=1.0, gamma=2.0):
    x = inputs.astype(jnp.float32)
    t = targets.astype(jnp.float32)
    bce = jnp.maximum(x, 0.0) - x * t + jnp.log1p(jnp.exp(-jnp.abs(x)))
    p_t = jnp.exp(-bce)
    return alpha * (1.0 - p_t) ** gamma * bce


if __name__ == "__main__":
    key = jax.random.PRNGKey(0)
    k1, k2, k3, k4, k5, k6, k7, k8 = jax.random.split(key, 8)

    # Small NCHW-shaped logits and binary targets (segmentation-head style).
    x = jax.random.normal(k1, (2, 4, 16, 16), dtype=jnp.float32) * 2.0
    t = (jax.random.uniform(k2, (2, 4, 16, 16)) > 0.5).astype(jnp.float32)

    loss_mean = jax.block_until_ready(focal_loss(x, t, 1.0, 2.0, "mean"))
    loss_sum = jax.block_until_ready(focal_loss(x, t, 0.25, 2.0, "sum"))
    loss_none = jax.block_until_ready(focal_loss(x, t, 1.0, 2.0, "none"))

    ref_mean = jnp.mean(_focal_ref_elem(x, t, 1.0, 2.0))
    ref_sum = jnp.sum(_focal_ref_elem(x, t, 0.25, 2.0))
    ref_none = _focal_ref_elem(x, t, 1.0, 2.0)

    assert jnp.allclose(loss_mean, ref_mean, rtol=1e-5, atol=1e-6), (loss_mean, ref_mean)
    assert jnp.allclose(loss_sum, ref_sum, rtol=1e-5, atol=1e-6), (loss_sum, ref_sum)
    assert jnp.allclose(loss_none, ref_none, rtol=1e-5, atol=1e-6)

    # Ragged element count: exercises the safe-pad path (no in-kernel mask).
    xr = jax.random.normal(k3, (3, 5, 7, 11), dtype=jnp.float32)
    tr = (jax.random.uniform(k4, (3, 5, 7, 11)) > 0.5).astype(jnp.float32)
    loss_r = jax.block_until_ready(focal_loss(xr, tr, reduction="mean"))
    ref_r = jnp.mean(_focal_ref_elem(xr, tr, 1.0, 2.0))
    assert jnp.allclose(loss_r, ref_r, rtol=1e-5, atol=1e-6), (loss_r, ref_r)

    # Multi-block grid + partial tail block (forced small block for coverage).
    xm = jax.random.normal(k5, (2, 3, 16, 32), dtype=jnp.float32)
    tm = (jax.random.uniform(k6, (2, 3, 16, 32)) > 0.5).astype(jnp.float32)
    loss_m = jax.block_until_ready(
        focal_loss(xm, tm, 0.5, 2.0, "sum", max_block_rows=16))
    ref_m = jnp.sum(_focal_ref_elem(xm, tm, 0.5, 2.0))
    assert jnp.allclose(loss_m, ref_m, rtol=1e-5, atol=1e-6), (loss_m, ref_m)
    none_m = jax.block_until_ready(
        focal_loss(xm, tm, 1.0, 2.0, "none", max_block_rows=16))
    assert jnp.allclose(none_m, _focal_ref_elem(xm, tm, 1.0, 2.0),
                        rtol=1e-5, atol=1e-6)

    # Multi-chunk in-kernel fori_loop path (m_rows = 512 > one 256-row chunk).
    xl = jax.random.normal(k7, (2, 4, 64, 128), dtype=jnp.float32)
    tl = (jax.random.uniform(k8, (2, 4, 64, 128)) > 0.5).astype(jnp.float32)
    loss_l = jax.block_until_ready(focal_loss(xl, tl, reduction="mean"))
    ref_l = jnp.mean(_focal_ref_elem(xl, tl, 1.0, 2.0))
    assert jnp.allclose(loss_l, ref_l, rtol=1e-4, atol=1e-6), (loss_l, ref_l)

    # Binary-target fast path (one fewer EUP transcendental; approx reciprocal).
    loss_b = jax.block_until_ready(
        focal_loss(x, t, 1.0, 2.0, "mean", binary_targets=True))
    assert jnp.allclose(loss_b, ref_mean, rtol=2e-3, atol=1e-4), (loss_b, ref_mean)

    print("KERNEL_OK")
</pallas_src>

<mosaic_0001>
module attributes {stable_mosaic.version = 11 : i64} {
  func.func @_focal_sum_kernel(%arg0: i32, %arg1: i32, %arg2: memref<16x128xf32, #tpu.memory_space<vmem>>, %arg3: memref<16x128xf32, #tpu.memory_space<vmem>>, %arg4: memref<8x128xf32, #tpu.memory_space<vmem>>) attributes {dimension_semantics = [#tpu.dimension_semantics<parallel>, #tpu.dimension_semantics<arbitrary>], iteration_bounds = array<i64: 1, 1>, scalar_prefetch = 0 : i64, scratch_operands = 0 : i64, tpu.core_type = #tpu.core_type<tc>, window_params = [{transform_indices = @transform_0, window_bounds = array<i64: 16, 128>}, {transform_indices = @transform_1, window_bounds = array<i64: 16, 128>}, {transform_indices = @transform_2, window_bounds = array<i64: 8, 128>}]} {
    %c0_i32 = arith.constant 0 : i32
    %0 = arith.cmpi eq, %arg1, %c0_i32 : i32
    %1 = arith.extui %0 : i1 to i32
    %c0_i32_0 = arith.constant 0 : i32
    %2 = arith.cmpi ne, %1, %c0_i32_0 : i32
    scf.if %2 {
      %cst = arith.constant 0.000000e+00 : f32
      %8 = vector.broadcast %cst : f32 to vector<8x128xf32>
      %c0 = arith.constant 0 : index
      %c0_3 = arith.constant 0 : index
      %9 = vector.load %arg4[%c0, %c0_3] : memref<8x128xf32, #tpu.memory_space<vmem>>, vector<8x128xf32>
      tpu.vector_store %arg4[%c0, %c0_3], %8 {strides = array<i32>} : memref<8x128xf32, #tpu.memory_space<vmem>>, vector<8x128xf32>,
    } else {
    }
    %c1_i32 = arith.constant 1 : i32
    %3 = arith.muli %arg0, %c1_i32 : i32
    %4 = arith.addi %3, %arg1 : i32
    %c1_i32_1 = arith.constant 1 : i32
    %5 = arith.cmpi slt, %4, %c1_i32_1 : i32
    %6 = arith.extui %5 : i1 to i32
    %c0_i32_2 = arith.constant 0 : i32
    %7 = arith.cmpi ne, %6, %c0_i32_2 : i32
    scf.if %7 {
      %c0 = arith.constant 0 : index
      %c0_3 = arith.constant 0 : index
      %8 = vector.load %arg2[%c0, %c0_3] : memref<16x128xf32, #tpu.memory_space<vmem>>, vector<16x128xf32>
      %c0_4 = arith.constant 0 : index
      %c0_5 = arith.constant 0 : index
      %9 = vector.load %arg3[%c0_4, %c0_5] : memref<16x128xf32, #tpu.memory_space<vmem>>, vector<16x128xf32>
      %10 = math.absf %8 : vector<16x128xf32>
      %cst = arith.constant 0.000000e+00 : f32
      %11 = vector.broadcast %cst : f32 to vector<16x128xf32>
      %12 = arith.subf %11, %10 : vector<16x128xf32>
      %13 = math.exp %12 : vector<16x128xf32>
      %cst_6 = arith.constant 0.000000e+00 : f32
      %14 = vector.broadcast %cst_6 : f32 to vector<16x128xf32>
      %15 = arith.maximumf %8, %14 : vector<16x128xf32>
      %16 = arith.mulf %8, %9 : vector<16x128xf32>
      %17 = arith.subf %15, %16 : vector<16x128xf32>
      %18 = math.log1p %13 : vector<16x128xf32>
      %19 = arith.addf %17, %18 : vector<16x128xf32>
      %cst_7 = arith.constant 0.000000e+00 : f32
      %20 = vector.broadcast %cst_7 : f32 to vector<16x128xf32>
      %21 = arith.subf %20, %19 : vector<16x128xf32>
      %22 = math.exp %21 : vector<16x128xf32>
      %cst_8 = arith.constant 1.000000e+00 : f32
      %23 = vector.broadcast %cst_8 : f32 to vector<16x128xf32>
      %24 = arith.subf %23, %22 : vector<16x128xf32>
      %25 = arith.mulf %24, %24 : vector<16x128xf32>
      %26 = arith.mulf %25, %19 : vector<16x128xf32>
      %c0_9 = arith.constant 0 : index
      %c0_10 = arith.constant 0 : index
      %27 = vector.load %arg4[%c0_9, %c0_10] : memref<8x128xf32, #tpu.memory_space<vmem>>, vector<8x128xf32>
      %28 = vector.shape_cast %26 : vector<16x128xf32> to vector<2x8x128xf32>
      %cst_11 = arith.constant dense<0.000000e+00> : vector<8x128xf32>
      %29 = vector.multi_reduction <add>, %28, %cst_11 [0] : vector<2x8x128xf32> to vector<8x128xf32>
      %30 = arith.addf %27, %29 : vector<8x128xf32>
      %c0_12 = arith.constant 0 : index
      %c0_13 = arith.constant 0 : index
      %31 = vector.load %arg4[%c0_12, %c0_13] : memref<8x128xf32, #tpu.memory_space<vmem>>, vector<8x128xf32>
      tpu.vector_store %arg4[%c0_12, %c0_13], %30 {strides = array<i32>} : memref<8x128xf32, #tpu.memory_space<vmem>>, vector<8x128xf32>,
    } else {
    }
    return
  }
  func.func @transform_0(%arg0: i32, %arg1: i32) -> (i32, i32) {
    %c1_i32 = arith.constant 1 : i32
    %0 = arith.muli %arg0, %c1_i32 : i32
    %1 = arith.addi %0, %arg1 : i32
    %c0_i32 = arith.constant 0 : i32
    %2 = arith.minsi %1, %c0_i32 : i32
    %c0_i32_0 = arith.constant 0 : i32
    %c0_i32_1 = arith.constant 0 : i32
    return %2, %c0_i32_0 : i32, i32
  }
  func.func @transform_1(%arg0: i32, %arg1: i32) -> (i32, i32) {
    %c1_i32 = arith.constant 1 : i32
    %0 = arith.muli %arg0, %c1_i32 : i32
    %1 = arith.addi %0, %arg1 : i32
    %c0_i32 = arith.constant 0 : i32
    %2 = arith.minsi %1, %c0_i32 : i32
    %c0_i32_0 = arith.constant 0 : i32
    %c0_i32_1 = arith.constant 0 : i32
    return %2, %c0_i32_0 : i32, i32
  }
  func.func @transform_2(%arg0: i32, %arg1: i32) -> (i32, i32) {
    %c0_i32 = arith.constant 0 : i32
    %c0_i32_0 = arith.constant 0 : i32
    return %arg0, %c0_i32 : i32, i32
  }
}

</mosaic_0001>

<bundles_post_ra>
// kernel: tpu_custom_call.1
= control target key start
LH: loop header
LB: loop body
LE: loop exit
PB: predicated region body
PF: predicated region fallthrough
CT: control target
= control target key end

     0   :  { %7 = vsyncpa [#allocation3], 0  ;;  %s290_s0 = inlined_call_operand.hbm [shape: f32[16,128], index: 0, kind: input, shape index: {}]   ;;  %s291_s1 = inlined_call_operand.hbm [shape: f32[16,128], index: 1, kind: input, shape index: {}]   ;;  %s292_s2 = inlined_call_operand.hbm [shape: f32[8,128], index: 2, kind: output, shape index: {}]  }
   0x1   :  { %8 = vsyncpa [#allocation6], 0 }
   0x2   :  { %9 = vsyncpa [#allocation4], 0  ;;  %s234_s9 = smov [#allocation2]   ;;  %s162_s13 = scalar_lea.hbm %s290_s0, 256 }
   0x3   :  { %s21_s10 = sshll.u32 %s234_s9, 4  ;;  %p163_p0 = scmp.ne.s32.totalorder %s290_s0, %s162_s13  ;;  %s22_s10 = int_to_ptr.vmem [resolvable:$true] %s21_s10 }
   0x4   :  { %p166_p1 = scmp.lt.u32.totalorder %s162_s13, %s290_s0 }
   0x6   :  { %p168_p2 = pnand %p166_p1, %p163_p0 }
   0x8   :  { %171 = shalt.err (!%p168_p2)
}
   0x9   :  { %s172_s18 = scalar_lea.vmem %s22_s10, 256  ;;  %p177_p4 = scmp.lt.s32.totalorder %s22_s10, %s22_s10 }
   0xa   :  { %p173_p3 = scmp.ne.s32.totalorder %s22_s10, %s172_s18  ;;  %p178_p5 = scmp.lt.s32.totalorder %s172_s18, %s172_s18 }
   0xc   :  { %p179_p6 = por %p178_p5, %p177_p4 }
   0xe   :  { %p180_p7 = pnand %p179_p6, %p173_p3 }
  0x10   :  { %183 = shalt.err (!%p180_p7)
}
  0x11   :  { %s235_s19 = smov 128   ;;  %s236_s20 = smov 8  }
  0x12   :  { %27 = dma.hbm_to_vmem [thread:$0]  %s290_s0, 256, %s22_s10, [#allocation3], %s235_s19, %s235_s19, %s236_s20  }
  0x13   :  { %s237_s23 = smov [#allocation5]   ;;  %s184_s27 = scalar_lea.hbm %s291_s1, 256 }
  0x14   :  { %s39_s24 = sshll.u32 %s237_s23, 4  ;;  %p185_p8 = scmp.ne.s32.totalorder %s291_s1, %s184_s27  ;;  %s40_s24 = int_to_ptr.vmem [resolvable:$true] %s39_s24 }
  0x15   :  { %p188_p9 = scmp.lt.u32.totalorder %s184_s27, %s291_s1 }
  0x17   :  { %p190_p10 = pnand %p188_p9, %p185_p8 }
  0x19   :  { %193 = shalt.err (!%p190_p10)
}
  0x1a   :  { %s194_s4 = scalar_lea.vmem %s40_s24, 256  ;;  %p199_p12 = scmp.lt.s32.totalorder %s40_s24, %s40_s24 }
  0x1b   :  { %p195_p11 = scmp.ne.s32.totalorder %s40_s24, %s194_s4  ;;  %p200_p13 = scmp.lt.s32.totalorder %s194_s4, %s194_s4 }
  0x1d   :  { %p201_p0 = por %p200_p13, %p199_p12 }
  0x1f   :  { %p202_p1 = pnand %p201_p0, %p195_p11 }
  0x21   :  { %205 = shalt.err (!%p202_p1)
}
  0x22   :  { %45 = dma.hbm_to_vmem [thread:$0]  %s291_s1, 256, %s40_s24, [#allocation6], %s235_s19, %s235_s19, %s236_s20  }
  0x23   :  { %228 = dma.done.wait [#allocation3], 256  }
  0x24   :  { %229 = vsyncadd [#allocation3], 4294967040 }
  0x25   :  { %230 = dma.done.wait [#allocation6], 256  }
  0x26   :  { %231 = vsyncadd [#allocation6], 4294967040  ;;  %v70_v0 = vld [vmem:[#allocation2] sm:$0xff]  ;;  %v71_v1 = vld [vmem:[#allocation2 + $0x8] sm:$0xff]  ;;  %s238_s1 = smov [#allocation7]  }
  0x27   :  { %v74_v2 = vand.u32 2147483647, %v70_v0  ;;  %v75_v3 = vand.u32 2147483647, %v71_v1  ;;  %v72_v14 = vld [vmem:[#allocation5] sm:$0xff]  ;;  %v73_v15 = vld [vmem:[#allocation5 + $0x8] sm:$0xff] }
  0x28   :  { %v82_v17 = vmax.f32 %v70_v0, 0.0  ;;  %v84_v18 = vmul.f32 %v72_v14, %v70_v0  ;;  %v83_v21 = vmax.f32 %v71_v1, 0.0  ;;  %v85_v22 = vmul.f32 %v73_v15, %v71_v1  ;;  %s130_s6 = sshll.u32 %s238_s1, 4  ;;  %s131_s6 = int_to_ptr.vmem [resolvable:$true] %s130_s6 }
  0x29   :  { %v76_v4 = vsub.f32 0.0, %v74_v2  ;;  %v77_v5 = vsub.f32 0.0, %v75_v3  ;;  %s206_s7 = scalar_lea.vmem %s131_s6, 128  ;;  %p211_p3 = scmp.lt.s32.totalorder %s131_s6, %s131_s6 }
  0x2a   :  { %v86_v26 = vsub.f32 %v82_v17, %v84_v18  ;;  %v87_v29 = vsub.f32 %v83_v21, %v85_v22  ;;  %p207_p2 = scmp.ne.s32.totalorder %s131_s6, %s206_s7  ;;  %p212_p4 = scmp.lt.s32.totalorder %s206_s7, %s206_s7 }
  0x2b   :  { %v78_v6 = vmul.f32 1.442695, %v76_v4  ;;  %v80_v7 = vmul.f32 1.442695, %v77_v5 }
  0x2c   :  { %p213_p5 = por %p212_p4, %p211_p3 }
  0x2d   :  { %150 = vpow2.f32 %v78_v6 }
  0x2e   :  { %152 = vpow2.f32 %v80_v7  ;;  %p214_p6 = pnand %p213_p5, %p207_p2 }
  0x37   :  { %v151_v8 = vpop.eup %150 }
  0x38   :  { %v153_v9 = vpop.eup %152  ;;  %v88_v10 = vadd.f32 1.0, %v151_v8  ;;  %v91_v12 = vmul.f32 -0.5, %v151_v8  ;;  %v94_v19 = vand.u32 2147483647, %v151_v8 }
  0x39   :  { %v97_v11 = vadd.f32 1.0, %v153_v9  ;;  %v100_v13 = vmul.f32 -0.5, %v153_v9  ;;  %v103_v23 = vand.u32 2147483647, %v153_v9 }
  0x3a   :  { %154 = vlog2.f32 %v88_v10  ;;  %v92_v16 = vadd.f32 1.0, %v91_v12  ;;  %vm95_vm0 = vcmp.lt.f32.partialorder %v94_v19, 0.0004427343 }
  0x3b   :  { %156 = vlog2.f32 %v97_v11  ;;  %v101_v20 = vadd.f32 1.0, %v100_v13  ;;  %vm104_vm1 = vcmp.lt.f32.partialorder %v103_v23, 0.0004427343 }
  0x3c   :  { %v93_v24 = vmul.f32 %v151_v8, %v92_v16 }
  0x3d   :  { %v102_v27 = vmul.f32 %v153_v9, %v101_v20 }
  0x44   :  { %v155_v25 = vpop.eup %154 }
  0x45   :  { %v157_v28 = vpop.eup %156  ;;  %v90_v30 = vmul.f32 0.6931472, %v155_v25 }
  0x46   :  { %v99_v31 = vmul.f32 0.6931472, %v157_v28 }
  0x47   :  { %v96_v32 = vsel %vm95_vm0, %v93_v24, %v90_v30 }
  0x48   :  { %v105_v33 = vsel %vm104_vm1, %v102_v27, %v99_v31  ;;  %v106_v34 = vadd.f32 %v96_v32, %v86_v26 }
  0x49   :  { %v107_v35 = vadd.f32 %v105_v33, %v87_v29 }
  0x4a   :  { %v108_v36 = vsub.f32 0.0, %v106_v34 }
  0x4b   :  { %v109_v37 = vsub.f32 0.0, %v107_v35 }
  0x4c   :  { %v110_v38 = vmul.f32 1.442695, %v108_v36 }
  0x4d   :  { %v112_v39 = vmul.f32 1.442695, %v109_v37 }
  0x4e   :  { %158 = vpow2.f32 %v110_v38 }
  0x4f   :  { %160 = vpow2.f32 %v112_v39 }
  0x58   :  { %v159_v40 = vpop.eup %158 }
  0x59   :  { %v161_v41 = vpop.eup %160  ;;  %v114_v42 = vsub.f32 1.0, %v159_v40 }
  0x5a   :  { %v115_v43 = vsub.f32 1.0, %v161_v41 }
  0x5b   :  { %v116_v44 = vmul.f32 %v114_v42, %v114_v42 }
  0x5c   :  { %v117_v45 = vmul.f32 %v115_v43, %v115_v43 }
  0x5d   :  { %v118_v46 = vmul.f32 %v116_v44, %v106_v34 }
  0x5e   :  { %v119_v47 = vmul.f32 %v117_v45, %v107_v35 }
  0x60   :  { %v121_v48 = vadd.f32 %v119_v47, %v118_v46 }
  0x62   :  { %123 = vst [vmem:[#allocation7] sm:$0xff] %v121_v48 }
  0x63   :  { %217 = shalt.err (!%p214_p6)
}
  0x64   :  { %s218_s10 = scalar_lea.hbm %s292_s2, 128 }
  0x65   :  { %p219_p7 = scmp.ne.s32.totalorder %s292_s2, %s218_s10  ;;  %p222_p8 = scmp.lt.u32.totalorder %s218_s10, %s292_s2 }
  0x67   :  { %p224_p9 = pnand %p222_p8, %p219_p7 }
  0x69   :  { %227 = shalt.err (!%p224_p9)
}
  0x6a   :  { %133 = dma.vmem_to_hbm [thread:$0]  %s131_s6, 128, %s292_s2, [#allocation4]  }
  0x6b   :  { %232 = dma.done.wait [#allocation4], 128  }
  0x6c   :  { %233 = vsyncadd [#allocation4], 4294967168 }
  0x6d   :  { %137 = vsyncpa [#allocation3], 1 }
  0x6e   :  { %138 = vsyncpa [#allocation6], 1 }
  0x6f   :  { %139 = vsyncpa [#allocation4], 1 }

</bundles_post_ra>
